<compile_context>
chip_gen: v5e
topology: v5e:2x2
jax: 0.10.0
libtpu: 0.0.40
codegen_flags: <defaults>
</compile_context>

<pallas_src>
import jax
import jax.numpy as jnp
from jax.experimental import pallas as pl
from jax.experimental.pallas import tpu as pltpu

LANE = 128
SUB = 8


def _seq_avg_kernel(lens_ref, x_ref, o_ref):
    # lens_ref : VMEM (tb, 1)      int32  -- clamped sequence lengths
    # x_ref    : VMEM (tb, ts, td) f32    -- one (S-chunk, D-tile) slab
    # o_ref    : VMEM (tb, td)     f32    -- resident across the S-chunk axis
    k = pl.program_id(2)

    @pl.when(k == 0)
    def _():
        o_ref[...] = jnp.zeros_like(o_ref)

    x = x_ref[...]                                        # (tb, ts, td)
    tb, ts, _ = x.shape
    lens = lens_ref[...]                                  # (tb, 1) int32

    # Global timestep index for this chunk; one lane-column is enough.
    t_idx = k * ts + jax.lax.broadcasted_iota(jnp.int32, (tb, ts, 1), 1)
    mask = t_idx < lens[:, :, None]                       # (tb, ts, 1)
    masked = jnp.where(mask, x, jnp.zeros_like(x))        # broadcast over td
    o_ref[...] += jnp.sum(masked, axis=1)                 # (tb, td)

    @pl.when(k == pl.num_programs(2) - 1)
    def _():
        # Exact division. Zero-length rows give NaN, same as torch.mean of an
        # empty slice. TODO(synk): clamp to >=1 here if zero lengths must map to 0.
        inv = 1.0 / lens.astype(jnp.float32)              # (tb, 1)
        o_ref[...] = o_ref[...] * inv


def _round_up(x, m):
    return ((x + m - 1) // m) * m


def sequence_average_encoder(input_sequences, sequence_lengths):
    """input_sequences: (B, S, D) float32, sequence_lengths: (B,) -> (B, D)."""
    B, S, D = input_sequences.shape
    x = input_sequences.astype(jnp.float32)
    # Clamp to [0, S]: torch's seq[:length].mean(0) uses at most S rows, and
    # negative lengths must not produce garbage.
    lens = jnp.clip(sequence_lengths.astype(jnp.int32), 0, S)

    # --- tile sizing ------------------------------------------------------
    target_tile_bytes = 4 * 1024 * 1024   # ~4 MiB slab amortizes per-step overhead on v7x
    max_tile_bytes = 6 * 1024 * 1024      # 2x double-buffered stays < 16 MiB even on v5e

    # Lane-dense feature dim; tile D ("parallel") if a minimal (8, 8, td) slab
    # would already blow the budget (very large D).
    d_pad = _round_up(D, LANE)
    max_td = max(LANE, (max_tile_bytes // (SUB * SUB * 4)) // LANE * LANE)
    td = min(d_pad, max_td)
    d_total = _round_up(d_pad, td)

    # Batch tile: big enough to hit the target slab, but leave >=2 batch
    # blocks when the padded batch allows (megacore on the parallel axis).
    b_pad8 = _round_up(B, SUB)
    row_bytes = S * td * 4
    tb = _round_up(max(1, target_tile_bytes // max(1, row_bytes)), SUB)
    tb = min(tb, b_pad8)
    if b_pad8 >= 2 * SUB:
        tb = min(tb, max(SUB, (b_pad8 // 2) // SUB * SUB))

    # S chunking (reduction axis, last in grid).
    if tb * S * td * 4 <= max_tile_bytes:
        ts = S
        s_pad = S
    else:
        ts = max(SUB, (max_tile_bytes // (tb * td * 4)) // SUB * SUB)
        s_pad = _round_up(S, ts)

    b_pad = _round_up(B, tb)

    # Avoid a degenerate single-step grid: split S chunks (while they stay a
    # multiple of 8) so the BlockSpec pipeline has work to overlap.
    b_blocks = b_pad // tb
    d_blocks = d_total // td
    s_blocks = s_pad // ts
    while b_blocks * d_blocks * s_blocks < 4 and ts % (2 * SUB) == 0:
        ts //= 2
        s_blocks = s_pad // ts

    # --- padding (masked rows / timesteps / lanes contribute nothing) ------
    if b_pad != B or s_pad != S or d_total != D:
        x = jnp.pad(x, ((0, b_pad - B), (0, s_pad - S), (0, d_total - D)))
    lens2d = jnp.pad(lens, (0, b_pad - B), constant_values=1).reshape(b_pad, 1)

    grid = (b_blocks, d_blocks, s_blocks)

    # Explicit VMEM budget from the chosen tiles (double-buffered) + slack.
    in_tile_bytes = tb * ts * td * 4
    out_tile_bytes = tb * td * 4
    lens_tile_bytes = tb * LANE * 4          # (tb, 1) occupies full lane tiles
    vmem_limit = 2 * (in_tile_bytes + out_tile_bytes + lens_tile_bytes) + (4 << 20)
    vmem_limit = min(vmem_limit, 30 << 20)

    cost = pl.CostEstimate(
        flops=2 * b_pad * s_pad * d_total,
        transcendentals=0,
        bytes_accessed=b_pad * s_pad * d_total * 4 + b_pad * d_total * 4 + b_pad * 4,
    )

    out = pl.pallas_call(
        _seq_avg_kernel,
        out_shape=jax.ShapeDtypeStruct((b_pad, d_total), jnp.float32),
        grid_spec=pltpu.PrefetchScalarGridSpec(
            num_scalar_prefetch=0,
            grid=grid,
            in_specs=[
                pl.BlockSpec((tb, 1), lambda i, j, k: (i, 0)),         # lengths
                pl.BlockSpec((tb, ts, td), lambda i, j, k: (i, k, j)),  # sequences
            ],
            out_specs=pl.BlockSpec((tb, td), lambda i, j, k: (i, j)),
        ),
        compiler_params=pltpu.CompilerParams(
            dimension_semantics=("parallel", "parallel", "arbitrary"),
            vmem_limit_bytes=vmem_limit,
        ),
        cost_estimate=cost,
    )(lens2d, x)

    return out[:B, :D]


def _reference(input_sequences, sequence_lengths):
    # plain-JAX reference mirroring the PyTorch loop
    outs = []
    for b in range(input_sequences.shape[0]):
        L = int(sequence_lengths[b])
        outs.append(jnp.mean(input_sequences[b, :L], axis=0, keepdims=True))
    return jnp.concatenate(outs, axis=0)


if __name__ == "__main__":
    B, S, D = 2, 8, 32  # feature_dim = D (module's output_size)

    key = jax.random.PRNGKey(0)
    x = jax.random.normal(key, (B, S, D), dtype=jnp.float32)
    lengths = jnp.array([5, 8], dtype=jnp.int32)

    out = sequence_average_encoder(x, lengths)
    out = jax.block_until_ready(out)

    ref = _reference(x, lengths)
    assert out.shape == (B, D)
    assert jnp.allclose(out, ref, atol=1e-5, rtol=1e-5), "mismatch vs reference"

    print("KERNEL_OK")
</pallas_src>

<mosaic_0001>
module attributes {stable_mosaic.version = 11 : i64} {
  func.func @_seq_avg_kernel(%arg0: i32, %arg1: i32, %arg2: i32, %arg3: memref<8x1xi32, #tpu.memory_space<vmem>>, %arg4: memref<8x8x128xf32, #tpu.memory_space<vmem>>, %arg5: memref<8x128xf32, #tpu.memory_space<vmem>>) attributes {dimension_semantics = [#tpu.dimension_semantics<parallel>, #tpu.dimension_semantics<parallel>, #tpu.dimension_semantics<arbitrary>], iteration_bounds = array<i64: 1, 1, 1>, scalar_prefetch = 0 : i64, scratch_operands = 0 : i64, tpu.core_type = #tpu.core_type<tc>, window_params = [{transform_indices = @transform_0, window_bounds = array<i64: 8, 1>}, {transform_indices = @transform_1, window_bounds = array<i64: 8, 8, 128>}, {transform_indices = @transform_2, window_bounds = array<i64: 8, 128>}]} {
    %c0_i32 = arith.constant 0 : i32
    %0 = arith.cmpi eq, %arg2, %c0_i32 : i32
    %1 = arith.extui %0 : i1 to i32
    %c0_i32_0 = arith.constant 0 : i32
    %2 = arith.cmpi ne, %1, %c0_i32_0 : i32
    scf.if %2 {
      %cst_12 = arith.constant 0.000000e+00 : f32
      %23 = vector.broadcast %cst_12 : f32 to vector<8x128xf32>
      %c0_13 = arith.constant 0 : index
      %c0_14 = arith.constant 0 : index
      %24 = vector.load %arg5[%c0_13, %c0_14] : memref<8x128xf32, #tpu.memory_space<vmem>>, vector<8x128xf32>
      tpu.vector_store %arg5[%c0_13, %c0_14], %23 {strides = array<i32>} : memref<8x128xf32, #tpu.memory_space<vmem>>, vector<8x128xf32>,
    } else {
    }
    %c0 = arith.constant 0 : index
    %c0_1 = arith.constant 0 : index
    %c0_2 = arith.constant 0 : index
    %3 = vector.load %arg4[%c0, %c0_1, %c0_2] : memref<8x8x128xf32, #tpu.memory_space<vmem>>, vector<8x8x128xf32>
    %c0_3 = arith.constant 0 : index
    %c0_4 = arith.constant 0 : index
    %4 = vector.load %arg3[%c0_3, %c0_4] : memref<8x1xi32, #tpu.memory_space<vmem>>, vector<8x1xi32>
    %c8_i32 = arith.constant 8 : i32
    %5 = arith.muli %arg2, %c8_i32 : i32
    %6 = tpu.iota {dimensions = array<i32: 1>} : vector<8x8x1xi32>
    %7 = vector.broadcast %5 : i32 to vector<8x8x1xi32>
    %8 = arith.addi %7, %6 : vector<8x8x1xi32>
    %9 = vector.shape_cast %4 : vector<8x1xi32> to vector<8x1x1xi32>
    %10 = vector.broadcast %9 : vector<8x1x1xi32> to vector<8x8x1xi32>
    %11 = arith.cmpi slt, %8, %10 : vector<8x8x1xi32>
    %cst = arith.constant 0.000000e+00 : f32
    %12 = vector.broadcast %cst : f32 to vector<8x8x128xf32>
    %13 = vector.shape_cast %11 : vector<8x8x1xi1> to vector<8x8x1xi1>
    %14 = vector.broadcast %13 : vector<8x8x1xi1> to vector<8x8x128xi1>
    %15 = arith.select %14, %3, %12 : vector<8x8x128xi1>, vector<8x8x128xf32>
    %c0_5 = arith.constant 0 : index
    %c0_6 = arith.constant 0 : index
    %16 = vector.load %arg5[%c0_5, %c0_6] : memref<8x128xf32, #tpu.memory_space<vmem>>, vector<8x128xf32>
    %cst_7 = arith.constant dense<0.000000e+00> : vector<8x128xf32>
    %17 = vector.multi_reduction <add>, %15, %cst_7 [1] : vector<8x8x128xf32> to vector<8x128xf32>
    %18 = arith.addf %16, %17 : vector<8x128xf32>
    %c0_8 = arith.constant 0 : index
    %c0_9 = arith.constant 0 : index
    %19 = vector.load %arg5[%c0_8, %c0_9] : memref<8x128xf32, #tpu.memory_space<vmem>>, vector<8x128xf32>
    tpu.vector_store %arg5[%c0_8, %c0_9], %18 {strides = array<i32>} : memref<8x128xf32, #tpu.memory_space<vmem>>, vector<8x128xf32>,
    %c0_i32_10 = arith.constant 0 : i32
    %20 = arith.cmpi eq, %arg2, %c0_i32_10 : i32
    %21 = arith.extui %20 : i1 to i32
    %c0_i32_11 = arith.constant 0 : i32
    %22 = arith.cmpi ne, %21, %c0_i32_11 : i32
    scf.if %22 {
      %23 = arith.sitofp %4 : vector<8x1xi32> to vector<8x1xf32>
      %cst_12 = arith.constant 1.000000e+00 : f32
      %24 = vector.broadcast %cst_12 : f32 to vector<8x1xf32>
      %25 = arith.divf %24, %23 : vector<8x1xf32>
      %c0_13 = arith.constant 0 : index
      %c0_14 = arith.constant 0 : index
      %26 = vector.load %arg5[%c0_13, %c0_14] : memref<8x128xf32, #tpu.memory_space<vmem>>, vector<8x128xf32>
      %27 = vector.broadcast %25 : vector<8x1xf32> to vector<8x128xf32>
      %28 = arith.mulf %26, %27 : vector<8x128xf32>
      %c0_15 = arith.constant 0 : index
      %c0_16 = arith.constant 0 : index
      %29 = vector.load %arg5[%c0_15, %c0_16] : memref<8x128xf32, #tpu.memory_space<vmem>>, vector<8x128xf32>
      tpu.vector_store %arg5[%c0_15, %c0_16], %28 {strides = array<i32>} : memref<8x128xf32, #tpu.memory_space<vmem>>, vector<8x128xf32>,
    } else {
    }
    return
  }
  func.func @transform_0(%arg0: i32, %arg1: i32, %arg2: i32) -> (i32, i32) {
    %c0_i32 = arith.constant 0 : i32
    %c0_i32_0 = arith.constant 0 : i32
    return %arg0, %c0_i32 : i32, i32
  }
  func.func @transform_1(%arg0: i32, %arg1: i32, %arg2: i32) -> (i32, i32, i32) {
    %c0_i32 = arith.constant 0 : i32
    return %arg0, %arg2, %arg1 : i32, i32, i32
  }
  func.func @transform_2(%arg0: i32, %arg1: i32, %arg2: i32) -> (i32, i32) {
    %c0_i32 = arith.constant 0 : i32
    return %arg0, %arg1 : i32, i32
  }
}

</mosaic_0001>

<bundles_post_ra>
// kernel: tpu_custom_call.1
= control target key start
LH: loop header
LB: loop body
LE: loop exit
PB: predicated region body
PF: predicated region fallthrough
CT: control target
= control target key end

     0   :  { %7 = vsyncpa [#allocation3], 0  ;;  %s329_s0 = inlined_call_operand.vmem [shape: s32[8,1], index: 0, kind: input, shape index: {}]   ;;  %s330_s1 = inlined_call_operand.hbm [shape: f32[8,8,128], index: 1, kind: input, shape index: {}]   ;;  %s331_s2 = inlined_call_operand.hbm [shape: f32[8,128], index: 2, kind: output, shape index: {}]  }
   0x1   :  { %8 = vsyncpa [#allocation4], 0  ;;  %s15_s11 = sshll.u32 %s330_s1, 4  ;;  %s299_s12 = smov [#allocation2]   ;;  %s16_s11 = int_to_ptr.hbm [resolvable:$true] %s15_s11 }
   0x2   :  { %s17_s13 = sshll.u32 %s299_s12, 4  ;;  %s300_s14 = smov 128   ;;  %s18_s13 = int_to_ptr.vmem [resolvable:$true] %s17_s13 }
   0x3   :  { %s301_s15 = smov 8  }
   0x4   :  { %23 = dma.hbm_to_vmem [thread:$0]  %s16_s11, 1024, %s18_s13, [#allocation3], %s300_s14, %s300_s14, %s301_s15  }
   0x5   :  { %295 = dma.done.wait [#allocation3], 1024  }
   0x6   :  { %296 = vsyncadd [#allocation3], 4294966272  ;;  %v302_v0 = vmov 0   ;;  %v43_v1 = vlaneseq  ;;  %v41_v3 = vld [vmem:[%s329_s0] sm:$0xff]  ;;  %v35_v44 = vld [vmem:[#allocation2 + $0x10] sm:$0xff]  ;;  %s303_s0 = smov [#allocation5]  }
   0x7   :  { %242 = vset.pattern.permute.xlu0 %v302_v0  ;;  %243 = vset.pattern.permute.xlu1 %v302_v0  ;;  %v54_v4 = vperm.slane %v41_v3, 0  ;;  %v48_v5 = vrot.slane %v41_v3, 2  ;;  %v47_v6 = vrot.slane %v41_v3, 1  ;;  %v49_v7 = vrot.slane %v41_v3, 3  ;;  %v37_v39 = vld [vmem:[#allocation2 + $0x20] sm:$0xff]  ;;  %v38_v47 = vld [vmem:[#allocation2 + $0x28] sm:$0xff] }
   0x8   :  { %244 = vset.pattern.permute.xlu2 %v302_v0  ;;  %v44_v2 = vshrl.u32 %v43_v1, 7  ;;  %v50_v8 = vrot.slane %v41_v3, 4  ;;  %v51_v9 = vrot.slane %v41_v3, 5  ;;  %v52_v18 = vrot.slane %v41_v3, 6  ;;  %v33_v41 = vld [vmem:[#allocation2] sm:$0xff]  ;;  %v34_v56 = vld [vmem:[#allocation2 + $0x8] sm:$0xff] }
   0x9   :  { %v56_v10 = vperm.slane %v48_v5, 0  ;;  %v55_v11 = vperm.slane %v47_v6, 0  ;;  %v57_v14 = vperm.slane %v49_v7, 0  ;;  %v195_v19 = vcvt.s32.f32 %v41_v3  ;;  %v36_v60 = vld [vmem:[#allocation2 + $0x18] sm:$0xff]  ;;  %s224_s1 = sshll.u32 %s303_s0, 4  ;;  %s226_s20 = sshll.u32 %s331_s2, 4  ;;  %s225_s1 = int_to_ptr.vmem [resolvable:$true] %s224_s1  ;;  %s227_s20 = int_to_ptr.hbm [resolvable:$true] %s226_s20 }
   0xa   :  { %vm62_vm0 = vcmp.lt.s32.totalorder %v44_v2, %v54_v4  ;;  %v58_v13 = vperm.slane %v50_v8, 0  ;;  %v59_v16 = vperm.slane %v51_v9, 0  ;;  %v53_v20 = vrot.slane %v41_v3, 7 }
   0xb   :  { %v70_v12 = vsel %vm62_vm0, 1, %v302_v0  ;;  %vm64_vm1 = vcmp.lt.s32.totalorder %v44_v2, %v56_v10  ;;  %vm63_vm3 = vcmp.lt.s32.totalorder %v44_v2, %v55_v11  ;;  %vm65_vm4 = vcmp.lt.s32.totalorder %v44_v2, %v57_v14  ;;  %v39_v11 = vld [vmem:[#allocation2 + $0x30] sm:$0xff] }
   0xc   :  { %79 = vperm.xlu0 %242, %v70_v12   ;;  %v72_v15 = vsel %vm64_vm1, 1, %v302_v0  ;;  %vm66_vm2 = vcmp.lt.s32.totalorder %v44_v2, %v58_v13  ;;  %v71_v21 = vsel %vm63_vm3, 1, %v302_v0  ;;  %vm67_vm5 = vcmp.lt.s32.totalorder %v44_v2, %v59_v16 }
   0xd   :  { %85 = vperm.xlu1 %243, %v72_v15   ;;  %v74_v17 = vsel %vm66_vm2, 1, %v302_v0  ;;  %245 = vrcp.f32 %v195_v19  ;;  %v60_v22 = vperm.slane %v52_v18, 0  ;;  %v73_v23 = vsel %vm65_vm4, 1, %v302_v0 }
   0xe   :  { %91 = vperm.xlu2 %244, %v74_v17   ;;  %v61_v24 = vperm.slane %v53_v20, 0  ;;  %v75_v25 = vsel %vm67_vm5, 1, %v302_v0  ;;  %v207_v29 = vand.u32 2147483648, %v195_v19  ;;  %vm201_vm8 = vweird.f32 %v195_v19  ;;  %v40_v17 = vld [vmem:[#allocation2 + $0x38] sm:$0xff] }
   0xf   :  { %vm68_vm6 = vcmp.lt.s32.totalorder %v44_v2, %v60_v22  ;;  %v205_v31 = vand.u32 2147483647, %v195_v19  ;;  %vm175_vm3 = vcmask 1041409   ;;  %vm177_vm5 = vcmask 1042434  }
  0x10   :  { %vm69_vm7 = vcmp.lt.s32.totalorder %v44_v2, %v61_v24  ;;  %v76_v28 = vsel %vm68_vm6, 1, %v302_v0  ;;  %v208_v34 = vor.u32 1.1754944e-38, %v207_v29  ;;  %vm179_vm6 = vcmask 1043459  }
  0x11   :  { %v77_v32 = vsel %vm69_vm7, 1, %v302_v0  ;;  %vm206_vm11 = vcmp.eq.f32.partialorder %v205_v31, 8.507059e+37  ;;  %vm181_vm7 = vcmask 1044484  }
  0x13   :  { %v246_v26 = vpop.eup %245 }
  0x14   :  { %82 = vperm.xlu0 %242, %v71_v21   ;;  %v197_v27 = vmul.f32 %v246_v26, %v195_v19  ;;  %vm202_vm9 = vweird.f32 %v246_v26 }
  0x15   :  { %88 = vperm.xlu1 %243, %v73_v23   ;;  %vm203_vm10 = vmor %vm201_vm8, %vm202_vm9  ;;  %vm183_vm8 = vcmask 1045509   ;;  %vm185_vm9 = vcmask 1046534  }
  0x16   :  { %94 = vperm.xlu2 %244, %v75_v25   ;;  %v198_v30 = vsub.f32 1.0, %v197_v27 }
  0x18   :  { %v199_v33 = vmul.f32 %v246_v26, %v198_v30 }
  0x1a   :  { %v200_v35 = vadd.f32 %v246_v26, %v199_v33 }
  0x1c   :  { %97 = vperm.xlu0 %242, %v76_v28   ;;  %v204_v36 = vsel %vm203_vm10, %v246_v26, %v200_v35  ;;  %vm187_vm10 = vcmask 1047559  }
  0x1d   :  { %100 = vperm.xlu1 %243, %v77_v32   ;;  %v209_v37 = vsel %vm206_vm11, %v208_v34, %v204_v36 }
  0x1e   :  { %214 = vperm.xlu2 %244, %v209_v37  }
  0x68   :  { %v92_v38 = vpop.permute.xlu2 %91 }
  0x69   :  { %vm106_vm12 = vcmp.eq.s32.totalorder %v92_v38, 1 }
  0x6a   :  { %v114_v40 = vsel %vm106_vm12, %v37_v39, 0.0 }
  0x6b   :  { %v143_v45 = vrot.slane %v114_v40, 4 }
  0x6d   :  { %v144_v54 = vadd.f32 %v143_v45, %v114_v40 }
  0x6f   :  { %v145_v61 = vrot.slane %v144_v54, 2 }
  0x70   :  { %v95_v43 = vpop.permute.xlu2 %94 }
  0x71   :  { %vm107_vm14 = vcmp.eq.s32.totalorder %v95_v43, 1  ;;  %v146_v7 = vadd.f32 %v145_v61, %v144_v54 }
  0x72   :  { %v115_v52 = vsel %vm107_vm14, %v38_v47, 0.0 }
  0x73   :  { %v149_v58 = vrot.slane %v115_v52, 4  ;;  %v147_v18 = vrot.slane %v146_v7, 1 }
  0x75   :  { %v150_v3 = vadd.f32 %v149_v58, %v115_v52  ;;  %v148_v39 = vadd.f32 %v147_v18, %v146_v7 }
  0x77   :  { %v151_v13 = vrot.slane %v150_v3, 2 }
  0x79   :  { %v152_v26 = vadd.f32 %v151_v13, %v150_v3 }
  0x7b   :  { %v153_v37 = vrot.slane %v152_v26, 1 }
  0x7e   :  { %v80_v42 = vpop.permute.xlu0 %79 }
  0x7f   :  { %vm102_vm13 = vcmp.eq.s32.totalorder %v80_v42, 1  ;;  %v86_v48 = vpop.permute.xlu1 %85 }
  0x80   :  { %v110_v46 = vsel %vm102_vm13, %v33_v41, 0.0  ;;  %vm104_vm15 = vcmp.eq.s32.totalorder %v86_v48, 1 }
  0x81   :  { %v119_v49 = vrot.slane %v110_v46, 4  ;;  %v112_v50 = vsel %vm104_vm15, %v35_v44, 0.0 }
  0x82   :  { %v131_v53 = vrot.slane %v112_v50, 4 }
  0x83   :  { %v120_v51 = vadd.f32 %v119_v49, %v110_v46  ;;  %v154_v46 = vadd.f32 %v153_v37, %v152_v26 }
  0x84   :  { %v132_v55 = vadd.f32 %v131_v53, %v112_v50  ;;  %v215_v53 = vpop.permute.xlu2 %214 }
  0x85   :  { %v121_v57 = vrot.slane %v120_v51, 2 }
  0x86   :  { %v83_v59 = vpop.permute.xlu0 %82  ;;  %v133_v62 = vrot.slane %v132_v55, 2 }
  0x87   :  { %vm103_vm0 = vcmp.eq.s32.totalorder %v83_v59, 1  ;;  %v89_v0 = vpop.permute.xlu1 %88  ;;  %v122_v2 = vadd.f32 %v121_v57, %v120_v51 }
  0x88   :  { %v111_v63 = vsel %vm103_vm0, %v34_v56, 0.0  ;;  %vm105_vm1 = vcmp.eq.s32.totalorder %v89_v0, 1  ;;  %v134_v8 = vadd.f32 %v133_v62, %v132_v55 }
  0x89   :  { %v125_v1 = vrot.slane %v111_v63, 4  ;;  %v113_v4 = vsel %vm105_vm1, %v36_v60, 0.0  ;;  %v123_v12 = vrot.slane %v122_v2, 1 }
  0x8a   :  { %v137_v6 = vrot.slane %v113_v4, 4  ;;  %v135_v19 = vrot.slane %v134_v8, 1 }
  0x8b   :  { %v126_v5 = vadd.f32 %v125_v1, %v111_v63  ;;  %v124_v25 = vadd.f32 %v123_v12, %v122_v2 }
  0x8c   :  { %v138_v10 = vadd.f32 %v137_v6, %v113_v4  ;;  %v136_v32 = vadd.f32 %v135_v19, %v134_v8 }
  0x8d   :  { %v127_v9 = vrot.slane %v126_v5, 2 }
  0x8e   :  { %v98_v14 = vpop.permute.xlu0 %97  ;;  %v139_v16 = vrot.slane %v138_v10, 2 }
  0x8f   :  { %v128_v15 = vadd.f32 %v127_v9, %v126_v5  ;;  %vm108_vm2 = vcmp.eq.s32.totalorder %v98_v14, 1  ;;  %v101_v21 = vpop.permute.xlu1 %100 }
  0x90   :  { %v116_v20 = vsel %vm108_vm2, %v39_v11, 0.0  ;;  %v140_v23 = vadd.f32 %v139_v16, %v138_v10  ;;  %vm109_vm4 = vcmp.eq.s32.totalorder %v101_v21, 1 }
  0x91   :  { %v129_v22 = vrot.slane %v128_v15, 1  ;;  %v155_v24 = vrot.slane %v116_v20, 4  ;;  %v117_v27 = vsel %vm109_vm4, %v40_v17, 0.0 }
  0x92   :  { %v141_v29 = vrot.slane %v140_v23, 1  ;;  %v161_v31 = vrot.slane %v117_v27, 4 }
  0x93   :  { %v130_v28 = vadd.f32 %v129_v22, %v128_v15  ;;  %v156_v30 = vadd.f32 %v155_v24, %v116_v20 }
  0x94   :  { %v142_v34 = vadd.f32 %v141_v29, %v140_v23  ;;  %v162_v36 = vadd.f32 %v161_v31, %v117_v27 }
  0x95   :  { %v176_v33 = vsel %vm175_vm3, %v130_v28, %v124_v25  ;;  %v157_v35 = vrot.slane %v156_v30, 2 }
  0x96   :  { %v178_v38 = vsel %vm177_vm5, %v136_v32, %v176_v33  ;;  %v163_v42 = vrot.slane %v162_v36, 2 }
  0x97   :  { %v180_v40 = vsel %vm179_vm6, %v142_v34, %v178_v38  ;;  %v158_v41 = vadd.f32 %v157_v35, %v156_v30 }
  0x98   :  { %v182_v43 = vsel %vm181_vm7, %v148_v39, %v180_v40  ;;  %v164_v45 = vadd.f32 %v163_v42, %v162_v36 }
  0x99   :  { %v159_v44 = vrot.slane %v158_v41, 1  ;;  %v184_v49 = vsel %vm183_vm8, %v154_v46, %v182_v43 }
  0x9a   :  { %v165_v48 = vrot.slane %v164_v45, 1 }
  0x9b   :  { %v160_v47 = vadd.f32 %v159_v44, %v158_v41 }
  0x9c   :  { %v166_v51 = vadd.f32 %v165_v48, %v164_v45 }
  0x9d   :  { %v186_v50 = vsel %vm185_vm9, %v160_v47, %v184_v49 }
  0x9e   :  { %v188_v52 = vsel %vm187_vm10, %v166_v51, %v186_v50 }
  0x9f   :  { %v217_v54 = vmul.f32 %v215_v53, %v188_v52 }
  0xa1   :  { %218 = vst [vmem:[#allocation5] sm:$0xff] %v217_v54 }
  0xa2   :  { %229 = dma.vmem_to_hbm [thread:$0]  %s225_s1, 128, %s227_s20, [#allocation4]  }
  0xa3   :  { %297 = dma.done.wait [#allocation4], 128  }
  0xa4   :  { %298 = vsyncadd [#allocation4], 4294967168 }
  0xa5   :  { %234 = vsyncpa [#allocation3], 1 }
  0xa6   :  { %235 = vsyncpa [#allocation4], 1 }

</bundles_post_ra>
